<compile_context>
chip_gen: v7x
topology: tpu7x:2x2x1
jax: 0.10.0
libtpu: 0.0.40
codegen_flags: <defaults>
</compile_context>

<pallas_src>
import jax
import jax.numpy as jnp
from jax.experimental import pallas as pl
from jax.experimental.pallas import tpu as pltpu


def _round_up(x, m):
    return (x + m - 1) // m * m


def _mlp_kernel(x_ref, w1_ref, b1_ref, w2_ref, b2_ref, w3_ref, b3_ref, o_ref):
    # Layer 1: (TM, D_in) @ (D_in, 256) -> f32 accum; bias + ReLU in f32 on the VPU.
    h = jnp.dot(x_ref[...], w1_ref[...], preferred_element_type=jnp.float32)
    h = jnp.maximum(h + b1_ref[...], 0.0)
    # Dropout(0.3) -> identity (eval mode)

    # Layer 2: (TM, 256) @ (256, 128)
    h = jnp.dot(h.astype(jnp.bfloat16), w2_ref[...], preferred_element_type=jnp.float32)
    h = jnp.maximum(h + b2_ref[...], 0.0)
    # Dropout(0.3) -> identity (eval mode)

    # Layer 3: (TM, 128) @ (128, F_pad)   (F padded to a lane-dense multiple of 128)
    out = jnp.dot(h.astype(jnp.bfloat16), w3_ref[...], preferred_element_type=jnp.float32)
    o_ref[...] = (out + b3_ref[...]).astype(o_ref.dtype)


def ann_forward(x_nchw, params):
    """x_nchw: (B, C, H, W). params: dict of (in, out) weights / (1, out) biases (f32)."""
    B = x_nchw.shape[0]
    x = x_nchw.reshape(B, -1).astype(jnp.bfloat16)  # nn.Flatten (row-major NCHW)
    d_in = x.shape[1]
    features = params["w3"].shape[1]

    h1 = params["w1"].shape[1]   # 256
    h2 = params["w2"].shape[1]   # 128

    # Padded, lane-aligned problem sizes.
    d_pad = _round_up(d_in, 128)
    f_pad = _round_up(features, 128)
    tm = 256 if B >= 256 else _round_up(B, 8)
    b_pad = _round_up(B, tm)
    n_tiles = b_pad // tm

    # bf16 matmul operands; zero padding keeps results identical on the valid slice.
    if (b_pad, d_pad) != (B, d_in):
        x_p = jnp.zeros((b_pad, d_pad), jnp.bfloat16).at[:B, :d_in].set(x)
    else:
        x_p = x
    w1 = params["w1"].astype(jnp.bfloat16)
    if d_pad != d_in:
        w1 = jnp.zeros((d_pad, h1), jnp.bfloat16).at[:d_in, :].set(w1)
    b1 = params["b1"].astype(jnp.float32)
    w2 = params["w2"].astype(jnp.bfloat16)
    b2 = params["b2"].astype(jnp.float32)
    w3 = jnp.zeros((h2, f_pad), jnp.bfloat16).at[:, :features].set(
        params["w3"].astype(jnp.bfloat16))
    b3 = jnp.zeros((1, f_pad), jnp.float32).at[:, :features].set(
        params["b3"].astype(jnp.float32))

    flops = 2 * b_pad * (d_pad * h1 + h1 * h2 + h2 * f_pad)
    bytes_accessed = (
        x_p.size * 2 + w1.size * 2 + w2.size * 2 + w3.size * 2
        + (b1.size + b2.size + b3.size) * 4 + b_pad * f_pad * 4
    )

    const0 = lambda i: (0, 0)
    grid_spec = pltpu.PrefetchScalarGridSpec(
        num_scalar_prefetch=0,
        grid=(n_tiles,),
        in_specs=[
            pl.BlockSpec((tm, d_pad), lambda i: (i, 0)),   # x: tiled over batch
            pl.BlockSpec(w1.shape, const0),                # weights/biases: VMEM-resident
            pl.BlockSpec(b1.shape, const0),
            pl.BlockSpec(w2.shape, const0),
            pl.BlockSpec(b2.shape, const0),
            pl.BlockSpec(w3.shape, const0),
            pl.BlockSpec(b3.shape, const0),
        ],
        out_specs=pl.BlockSpec((tm, f_pad), lambda i: (i, 0)),
    )

    out_pad = pl.pallas_call(
        _mlp_kernel,
        out_shape=jax.ShapeDtypeStruct((b_pad, f_pad), jnp.float32),
        grid_spec=grid_spec,
        compiler_params=pltpu.CompilerParams(
            dimension_semantics=("parallel",),
        ),
        cost_estimate=pl.CostEstimate(
            flops=flops, transcendentals=0, bytes_accessed=bytes_accessed
        ),
    )(x_p, w1, b1, w2, b2, w3, b3)

    return out_pad[:B, :features]


def init_params(key, input_nodes, features):
    """Deterministic init mimicking nn.Linear (uniform +-1/sqrt(fan_in)).
    Weights stored as (in, out) = PyTorch weight.T."""
    ks = jax.random.split(key, 6)

    def lin(kw, kb, fan_in, fan_out):
        bound = 1.0 / jnp.sqrt(fan_in)
        w = jax.random.uniform(kw, (fan_in, fan_out), jnp.float32, -bound, bound)
        b = jax.random.uniform(kb, (1, fan_out), jnp.float32, -bound, bound)
        return w, b

    w1, b1 = lin(ks[0], ks[1], input_nodes, 256)
    w2, b2 = lin(ks[2], ks[3], 256, 128)
    w3, b3 = lin(ks[4], ks[5], 128, features)
    return {"w1": w1, "b1": b1, "w2": w2, "b2": b2, "w3": w3, "b3": b3}


if __name__ == "__main__":
    key = jax.random.PRNGKey(0)
    k_x, k_p = jax.random.split(key)

    # Small shapes: batch=8, channels=4, spatial=8x8 -> input_nodes = 4*8*8 = 256
    B, C, H, W = 8, 4, 8, 8
    input_nodes = C * H * W
    features = 10

    x = jax.random.normal(k_x, (B, C, H, W), jnp.float32)
    params = init_params(k_p, input_nodes, features)

    out = jax.block_until_ready(ann_forward(x, params))
    assert out.shape == (B, features)

    # Reference in plain JAX mirroring the kernel's numerics
    # (bf16 matmul operands, f32 accumulation, eval-mode dropout = identity).
    xf = x.reshape(B, -1)
    h = jnp.dot(xf.astype(jnp.bfloat16), params["w1"].astype(jnp.bfloat16),
                preferred_element_type=jnp.float32)
    h = jnp.maximum(h + params["b1"], 0.0)
    h = jnp.dot(h.astype(jnp.bfloat16), params["w2"].astype(jnp.bfloat16),
                preferred_element_type=jnp.float32)
    h = jnp.maximum(h + params["b2"], 0.0)
    ref = jnp.dot(h.astype(jnp.bfloat16), params["w3"].astype(jnp.bfloat16),
                  preferred_element_type=jnp.float32) + params["b3"]

    assert jnp.allclose(out, ref, atol=1e-2, rtol=1e-2), (
        float(jnp.max(jnp.abs(out - ref)))
    )

    print("KERNEL_OK")
</pallas_src>

<mosaic_0001>
module attributes {stable_mosaic.version = 11 : i64} {
  func.func @_mlp_kernel(%arg0: i32, %arg1: memref<8x256xbf16, #tpu.memory_space<vmem>>, %arg2: memref<256x256xbf16, #tpu.memory_space<vmem>>, %arg3: memref<1x256xf32, #tpu.memory_space<vmem>>, %arg4: memref<256x128xbf16, #tpu.memory_space<vmem>>, %arg5: memref<1x128xf32, #tpu.memory_space<vmem>>, %arg6: memref<128x128xbf16, #tpu.memory_space<vmem>>, %arg7: memref<1x128xf32, #tpu.memory_space<vmem>>, %arg8: memref<8x128xf32, #tpu.memory_space<vmem>>) attributes {dimension_semantics = [#tpu.dimension_semantics<parallel>], iteration_bounds = array<i64: 1>, scalar_prefetch = 0 : i64, scratch_operands = 0 : i64, tpu.core_type = #tpu.core_type<tc>, window_params = [{transform_indices = @transform_0, window_bounds = array<i64: 8, 256>}, {pipeline_mode = #tpu.pipeline_mode<synchronous>, transform_indices = @transform_1, window_bounds = array<i64: 256, 256>}, {pipeline_mode = #tpu.pipeline_mode<synchronous>, transform_indices = @transform_2, window_bounds = array<i64: 1, 256>}, {pipeline_mode = #tpu.pipeline_mode<synchronous>, transform_indices = @transform_3, window_bounds = array<i64: 256, 128>}, {pipeline_mode = #tpu.pipeline_mode<synchronous>, transform_indices = @transform_4, window_bounds = array<i64: 1, 128>}, {pipeline_mode = #tpu.pipeline_mode<synchronous>, transform_indices = @transform_5, window_bounds = array<i64: 128, 128>}, {pipeline_mode = #tpu.pipeline_mode<synchronous>, transform_indices = @transform_6, window_bounds = array<i64: 1, 128>}, {transform_indices = @transform_7, window_bounds = array<i64: 8, 128>}]} {
    %c0 = arith.constant 0 : index
    %c0_0 = arith.constant 0 : index
    %0 = vector.load %arg1[%c0, %c0_0] : memref<8x256xbf16, #tpu.memory_space<vmem>>, vector<8x256xbf16>
    %c0_1 = arith.constant 0 : index
    %c0_2 = arith.constant 0 : index
    %1 = vector.load %arg2[%c0_1, %c0_2] : memref<256x256xbf16, #tpu.memory_space<vmem>>, vector<256x256xbf16>
    %cst = arith.constant dense<0.000000e+00> : vector<8x256xf32>
    %2 = tpu.matmul %0, %1, %cst {dimension_numbers = #tpu.dot_dimension_numbers<[1], [0], [0], [1], [0, 0, 1, 1], [], []>} : vector<8x256xbf16>, vector<256x256xbf16>, vector<8x256xf32> -> vector<8x256xf32>
    %c0_3 = arith.constant 0 : index
    %c0_4 = arith.constant 0 : index
    %3 = vector.load %arg3[%c0_3, %c0_4] : memref<1x256xf32, #tpu.memory_space<vmem>>, vector<1x256xf32>
    %4 = vector.broadcast %3 : vector<1x256xf32> to vector<8x256xf32>
    %5 = arith.addf %2, %4 : vector<8x256xf32>
    %cst_5 = arith.constant 0.000000e+00 : f32
    %6 = vector.broadcast %cst_5 : f32 to vector<8x256xf32>
    %7 = arith.maximumf %5, %6 : vector<8x256xf32>
    %8 = arith.truncf %7 : vector<8x256xf32> to vector<8x256xbf16>
    %c0_6 = arith.constant 0 : index
    %c0_7 = arith.constant 0 : index
    %9 = vector.load %arg4[%c0_6, %c0_7] : memref<256x128xbf16, #tpu.memory_space<vmem>>, vector<256x128xbf16>
    %cst_8 = arith.constant dense<0.000000e+00> : vector<8x128xf32>
    %10 = tpu.matmul %8, %9, %cst_8 {dimension_numbers = #tpu.dot_dimension_numbers<[1], [0], [0], [1], [0, 0, 1, 1], [], []>} : vector<8x256xbf16>, vector<256x128xbf16>, vector<8x128xf32> -> vector<8x128xf32>
    %c0_9 = arith.constant 0 : index
    %c0_10 = arith.constant 0 : index
    %11 = vector.load %arg5[%c0_9, %c0_10] : memref<1x128xf32, #tpu.memory_space<vmem>>, vector<1x128xf32>
    %12 = vector.broadcast %11 : vector<1x128xf32> to vector<8x128xf32>
    %13 = arith.addf %10, %12 : vector<8x128xf32>
    %cst_11 = arith.constant 0.000000e+00 : f32
    %14 = vector.broadcast %cst_11 : f32 to vector<8x128xf32>
    %15 = arith.maximumf %13, %14 : vector<8x128xf32>
    %16 = arith.truncf %15 : vector<8x128xf32> to vector<8x128xbf16>
    %c0_12 = arith.constant 0 : index
    %c0_13 = arith.constant 0 : index
    %17 = vector.load %arg6[%c0_12, %c0_13] : memref<128x128xbf16, #tpu.memory_space<vmem>>, vector<128x128xbf16>
    %cst_14 = arith.constant dense<0.000000e+00> : vector<8x128xf32>
    %18 = tpu.matmul %16, %17, %cst_14 {dimension_numbers = #tpu.dot_dimension_numbers<[1], [0], [0], [1], [0, 0, 1, 1], [], []>} : vector<8x128xbf16>, vector<128x128xbf16>, vector<8x128xf32> -> vector<8x128xf32>
    %c0_15 = arith.constant 0 : index
    %c0_16 = arith.constant 0 : index
    %19 = vector.load %arg7[%c0_15, %c0_16] : memref<1x128xf32, #tpu.memory_space<vmem>>, vector<1x128xf32>
    %20 = vector.broadcast %19 : vector<1x128xf32> to vector<8x128xf32>
    %21 = arith.addf %18, %20 : vector<8x128xf32>
    %c0_17 = arith.constant 0 : index
    %c0_18 = arith.constant 0 : index
    %22 = vector.load %arg8[%c0_17, %c0_18] : memref<8x128xf32, #tpu.memory_space<vmem>>, vector<8x128xf32>
    tpu.vector_store %arg8[%c0_17, %c0_18], %21 {strides = array<i32>} : memref<8x128xf32, #tpu.memory_space<vmem>>, vector<8x128xf32>,
    return
  }
  func.func @transform_0(%arg0: i32) -> (i32, i32) {
    %c0_i32 = arith.constant 0 : i32
    %c0_i32_0 = arith.constant 0 : i32
    return %arg0, %c0_i32 : i32, i32
  }
  func.func @transform_1(%arg0: i32) -> (i32, i32) {
    %c0_i32 = arith.constant 0 : i32
    %c0_i32_0 = arith.constant 0 : i32
    %c0_i32_1 = arith.constant 0 : i32
    return %c0_i32, %c0_i32_0 : i32, i32
  }
  func.func @transform_2(%arg0: i32) -> (i32, i32) {
    %c0_i32 = arith.constant 0 : i32
    %c0_i32_0 = arith.constant 0 : i32
    %c0_i32_1 = arith.constant 0 : i32
    return %c0_i32, %c0_i32_0 : i32, i32
  }
  func.func @transform_3(%arg0: i32) -> (i32, i32) {
    %c0_i32 = arith.constant 0 : i32
    %c0_i32_0 = arith.constant 0 : i32
    %c0_i32_1 = arith.constant 0 : i32
    return %c0_i32, %c0_i32_0 : i32, i32
  }
  func.func @transform_4(%arg0: i32) -> (i32, i32) {
    %c0_i32 = arith.constant 0 : i32
    %c0_i32_0 = arith.constant 0 : i32
    %c0_i32_1 = arith.constant 0 : i32
    return %c0_i32, %c0_i32_0 : i32, i32
  }
  func.func @transform_5(%arg0: i32) -> (i32, i32) {
    %c0_i32 = arith.constant 0 : i32
    %c0_i32_0 = arith.constant 0 : i32
    %c0_i32_1 = arith.constant 0 : i32
    return %c0_i32, %c0_i32_0 : i32, i32
  }
  func.func @transform_6(%arg0: i32) -> (i32, i32) {
    %c0_i32 = arith.constant 0 : i32
    %c0_i32_0 = arith.constant 0 : i32
    %c0_i32_1 = arith.constant 0 : i32
    return %c0_i32, %c0_i32_0 : i32, i32
  }
  func.func @transform_7(%arg0: i32) -> (i32, i32) {
    %c0_i32 = arith.constant 0 : i32
    %c0_i32_0 = arith.constant 0 : i32
    return %arg0, %c0_i32 : i32, i32
  }
}

</mosaic_0001>

<bundles_post_ra>
// kernel: tpu_custom_call.1
= control target key start
LH: loop header
LB: loop body
LE: loop exit
PB: predicated region body
PF: predicated region fallthrough
CT: control target
= control target key end

     0   :  { %12 = vsyncpa [#allocation3], 0  ;;  %s1084_s0 = inlined_call_operand.hbm [shape: bf16[8,256], index: 0, kind: input, shape index: {}]   ;;  %s1085_s1 = inlined_call_operand.hbm [shape: bf16[256,256], index: 1, kind: input, shape index: {}]   ;;  %s1086_s2 = inlined_call_operand.vmem [shape: f32[1,256], index: 2, kind: input, shape index: {}]   ;;  %s1087_s3 = inlined_call_operand.hbm [shape: bf16[256,128], index: 3, kind: input, shape index: {}]   ;;  %s1088_s4 = inlined_call_operand.vmem [shape: f32[1,128], index: 4, kind: input, shape index: {}]   ;;  %s1089_s5 = inlined_call_operand.hbm [shape: bf16[128,128], index: 5, kind: input, shape index: {}]   ;;  %s1090_s6 = inlined_call_operand.vmem [shape: f32[1,128], index: 6, kind: input, shape index: {}]   ;;  %s1091_s7 = inlined_call_operand.hbm [shape: f32[8,128], index: 7, kind: output, shape index: {}]  }
   0x1   :  { %13 = vsyncpa [#allocation6], 0 }
   0x2   :  { %14 = vsyncpa [#allocation9], 0 }
   0x3   :  { %15 = vsyncpa [#allocation4], 0  ;;  %s958_s24 = smov [#allocation5]   ;;  %s840_s28 = scalar_lea.hbm %s1085_s1, 4096 }
   0x4   :  { %s31_s25 = sshll.u32 %s958_s24, 4  ;;  %p841_p0 = scmp.ne.s32.totalorder %s1085_s1, %s840_s28  ;;  %s32_s25 = int_to_ptr.vmem [resolvable:$true] %s31_s25 }
   0x5   :  { %p844_p1 = scmp.lt.u32.totalorder %s840_s28, %s1085_s1 }
   0x7   :  { %p846_p2 = pnand %p844_p1, %p841_p0 }
   0x9   :  { %849 = shalt.err (!%p846_p2)
}
   0xa   :  { %s850_s10 = scalar_lea.vmem %s32_s25, 4096  ;;  %p855_p4 = scmp.lt.s32.totalorder %s32_s25, %s32_s25 }
   0xb   :  { %p851_p3 = scmp.ne.s32.totalorder %s32_s25, %s850_s10  ;;  %p856_p5 = scmp.lt.s32.totalorder %s850_s10, %s850_s10 }
   0xd   :  { %p857_p6 = por %p856_p5, %p855_p4 }
   0xf   :  { %p858_p7 = pnand %p857_p6, %p851_p3 }
  0x11   :  { %861 = shalt.err (!%p858_p7)
}
  0x12   :  { %s959_s11 = smov 128   ;;  %s960_s12 = smov 8  }
  0x13   :  { %37 = dma.hbm_to_vmem [thread:$0]  %s1085_s1, 4096, %s32_s25, [#allocation6], %s959_s11, %s959_s11, %s960_s12  }
  0x14   :  { %s961_s15 = smov [#allocation2]   ;;  %s962_s17 = smov [#allocation7]  }
  0x15   :  { %s22_s16 = sshll.u32 %s961_s15, 4  ;;  %s45_s18 = sshll.u32 %s962_s17, 4  ;;  %s23_s16 = int_to_ptr.vmem [resolvable:$true] %s22_s16  ;;  %s46_s18 = int_to_ptr.vmem [resolvable:$true] %s45_s18 }
  0x16   :  { %s862_s21 = scalar_lea.hbm %s1084_s0, 128 }
  0x17   :  { %p863_p8 = scmp.ne.s32.totalorder %s1084_s0, %s862_s21  ;;  %p866_p9 = scmp.lt.u32.totalorder %s862_s21, %s1084_s0 }
  0x19   :  { %p868_p10 = pnand %p866_p9, %p863_p8 }
  0x1b   :  { %871 = shalt.err (!%p868_p10)
}
  0x1c   :  { %s872_s1 = scalar_lea.vmem %s23_s16, 128  ;;  %p877_p12 = scmp.lt.s32.totalorder %s23_s16, %s23_s16 }
  0x1d   :  { %p873_p11 = scmp.ne.s32.totalorder %s23_s16, %s872_s1  ;;  %p878_p13 = scmp.lt.s32.totalorder %s872_s1, %s872_s1 }
  0x1f   :  { %p879_p0 = por %p878_p13, %p877_p12 }
  0x21   :  { %p880_p1 = pnand %p879_p0, %p873_p11 }
  0x23   :  { %883 = shalt.err (!%p880_p1)
}
  0x24   :  { %25 = dma.hbm_to_vmem [thread:$0]  %s1084_s0, 128, %s23_s16, [#allocation3]  }
  0x25   :  { %s884_s30 = scalar_lea.hbm %s1087_s3, 2048 }
  0x26   :  { %p885_p2 = scmp.ne.s32.totalorder %s1087_s3, %s884_s30  ;;  %p888_p3 = scmp.lt.u32.totalorder %s884_s30, %s1087_s3 }
  0x28   :  { %p890_p4 = pnand %p888_p3, %p885_p2 }
  0x2a   :  { %893 = shalt.err (!%p890_p4)
}
  0x2b   :  { %s894_s12 = scalar_lea.vmem %s46_s18, 2048  ;;  %p899_p6 = scmp.lt.s32.totalorder %s46_s18, %s46_s18 }
  0x2c   :  { %p895_p5 = scmp.ne.s32.totalorder %s46_s18, %s894_s12  ;;  %p900_p7 = scmp.lt.s32.totalorder %s894_s12, %s894_s12 }
  0x2e   :  { %p901_p8 = por %p900_p7, %p899_p6 }
  0x30   :  { %p902_p9 = pnand %p901_p8, %p895_p5 }
  0x32   :  { %905 = shalt.err (!%p902_p9)
}
  0x33   :  { %s963_s0 = smov 64   ;;  %s964_s13 = smov 4  }
  0x34   :  { %51 = dma.hbm_to_vmem [thread:$0]  %s1087_s3, 2048, %s46_s18, [#allocation6], %s963_s0, %s963_s0, %s964_s13  }
  0x35   :  { %s965_s16 = smov [#allocation8]   ;;  %s906_s21 = scalar_lea.hbm %s1089_s5, 1024 }
  0x36   :  { %s59_s17 = sshll.u32 %s965_s16, 4  ;;  %p907_p10 = scmp.ne.s32.totalorder %s1089_s5, %s906_s21  ;;  %s60_s17 = int_to_ptr.vmem [resolvable:$true] %s59_s17 }
  0x37   :  { %p910_p11 = scmp.lt.u32.totalorder %s906_s21, %s1089_s5 }
  0x39   :  { %p912_p12 = pnand %p910_p11, %p907_p10 }
  0x3b   :  { %915 = shalt.err (!%p912_p12)
}
  0x3c   :  { %s916_s1 = scalar_lea.vmem %s60_s17, 1024  ;;  %p921_p0 = scmp.lt.s32.totalorder %s60_s17, %s60_s17 }
  0x3d   :  { %p917_p13 = scmp.ne.s32.totalorder %s60_s17, %s916_s1  ;;  %p922_p1 = scmp.lt.s32.totalorder %s916_s1, %s916_s1 }
  0x3f   :  { %p923_p2 = por %p922_p1, %p921_p0 }
  0x41   :  { %p924_p3 = pnand %p923_p2, %p917_p13 }
  0x43   :  { %927 = shalt.err (!%p924_p3)
}
  0x44   :  { %65 = dma.hbm_to_vmem [thread:$0]  %s1089_s5, 1024, %s60_s17, [#allocation9], %s963_s0, %s963_s0, %s964_s13  }
  0x45   :  { %950 = dma.done.wait [#allocation3], 128  }
  0x46   :  { %951 = vsyncadd [#allocation3], 4294967168 }
  0x47   :  { %952 = dma.done.wait [#allocation6], 6144  }
  0x48   :  { %953 = vsyncadd [#allocation6], 4294961152 }
  0x49   :  { %954 = dma.done.wait [#allocation9], 1024  }
  0x4a   :  { %955 = vsyncadd [#allocation9], 4294966272  ;;  %v766_v0 = vld [vmem:[#allocation5 + $0x4] ss:$8 sps:$4 sm:$0xff]   ;;  %v768_v1 = vld [vmem:[#allocation5] ss:$8 sps:$4 sm:$0xff]   ;;  %v116_v52 = vlaneseq }
  0x4b   :  { %293 = vmatprep.subr.bf16.mxu0 %v766_v0  ;;  %v769_v2 = vld [vmem:[#allocation5 + $0x14] ss:$8 sps:$4 sm:$0xff]   ;;  %v771_v3 = vld [vmem:[#allocation5 + $0x10] ss:$8 sps:$4 sm:$0xff]   ;;  %v772_v4 = vld [vmem:[#allocation5 + $0x24] ss:$8 sps:$4 sm:$0xff]  }
  0x4c   :  { %294 = vmatpush1.bf16.msra.mxu0 %v768_v1  ;;  %v774_v5 = vld [vmem:[#allocation5 + $0x20] ss:$8 sps:$4 sm:$0xff]   ;;  %v775_v6 = vld [vmem:[#allocation5 + $0x34] ss:$8 sps:$4 sm:$0xff]   ;;  %v777_v7 = vld [vmem:[#allocation5 + $0x30] ss:$8 sps:$4 sm:$0xff]  }
  0x4d   :  { %295 = vmatprep.subr.bf16.mxu0 %v769_v2  ;;  %v778_v8 = vld [vmem:[#allocation5 + $0x44] ss:$8 sps:$4 sm:$0xff]   ;;  %v780_v9 = vld [vmem:[#allocation5 + $0x40] ss:$8 sps:$4 sm:$0xff]   ;;  %v781_v10 = vld [vmem:[#allocation5 + $0x54] ss:$8 sps:$4 sm:$0xff]  }
  0x4e   :  { %v783_v11 = vld [vmem:[#allocation5 + $0x50] ss:$8 sps:$4 sm:$0xff]   ;;  %v784_v12 = vld [vmem:[#allocation5 + $0x64] ss:$8 sps:$4 sm:$0xff]   ;;  %v786_v13 = vld [vmem:[#allocation5 + $0x60] ss:$8 sps:$4 sm:$0xff]  }
  0x4f   :  { %v1057_v14 = vld [vmem:[#allocation2] sm:$0xff]  ;;  %v816_v17 = vld [vmem:[#allocation7 + $0x40] sm:$0xff]   ;;  %v818_v19 = vld [vmem:[#allocation7 + $0x48] sm:$0xff]   ;;  %v966_v51 = vmov 0.0   ;;  %v117_v53 = vshrl.u32 %v116_v52, 7  ;;  %vm967_vm0 = vmmov 0  }
  0x50   :  { %296 = vmatpush1.bf16.msra.mxu0 %v771_v3  ;;  %v787_v15 = vld [vmem:[#allocation5 + $0x74] ss:$8 sps:$4 sm:$0xff]   ;;  %v645_v16 = vcombine.high %v1057_v14, %v1057_v14  ;;  %v817_v18 = vld [vmem:[#allocation7] sm:$0xff]   ;;  %v789_v20 = vld [vmem:[#allocation5 + $0x70] ss:$8 sps:$4 sm:$0xff]   ;;  %704 = vmatprep.subr.bf16.mxu1 %v816_v17  ;;  %v644_v46 = vcombine.low %v1057_v14, %v1057_v14  ;;  %s968_s30 = smov [#allocation10]  }
  0x51   :  { %297 = vmatprep.subr.bf16.mxu0 %v772_v4  ;;  %705 = vmatpush3.bf16.msra.mxu1 %v817_v18  ;;  %v819_v21 = vld [vmem:[#allocation7 + $0x8] sm:$0xff]   ;;  %v820_v22 = vld [vmem:[#allocation7 + $0x50] sm:$0xff]   ;;  %v822_v26 = vld [vmem:[#allocation7 + $0x58] sm:$0xff]   ;;  %v118_v54 = vsub.s32 0, %v117_v53  ;;  %v122_v56 = vsub.s32 1, %v117_v53  ;;  %s633_s8 = sshll.u32 %s968_s30, 4  ;;  %s634_s8 = int_to_ptr.vmem [resolvable:$true] %s633_s8 }
  0x52   :  { %325 = vmatprep.mubr.bf16.mxu0 %v645_v16  ;;  %706 = vmatprep.subr.bf16.mxu1 %v818_v19  ;;  %v790_v23 = vld [vmem:[#allocation5 + $0x84] ss:$8 sps:$4 sm:$0xff]   ;;  %v792_v24 = vld [vmem:[#allocation5 + $0x80] ss:$8 sps:$4 sm:$0xff]   ;;  %v821_v25 = vld [vmem:[#allocation7 + $0x10] sm:$0xff]   ;;  %p933_p5 = scmp.lt.s32.totalorder %s634_s8, %s634_s8 }
  0x53   :  { %v793_v27 = vld [vmem:[#allocation5 + $0x94] ss:$8 sps:$4 sm:$0xff]   ;;  %v795_v28 = vld [vmem:[#allocation5 + $0x90] ss:$8 sps:$4 sm:$0xff]   ;;  %v824_v30 = vld [vmem:[#allocation7 + $0x60] sm:$0xff]  }
  0x54   :  { %298 = vmatpush1.bf16.msra.mxu0 %v774_v5  ;;  %v823_v29 = vld [vmem:[#allocation7 + $0x18] sm:$0xff]   ;;  %v796_v31 = vld [vmem:[#allocation5 + $0xa4] ss:$8 sps:$4 sm:$0xff]   ;;  %v798_v33 = vld [vmem:[#allocation5 + $0xa0] ss:$8 sps:$4 sm:$0xff]  }
  0x55   :  { %299 = vmatprep.subr.bf16.mxu0 %v775_v6  ;;  %707 = vmatpush3.bf16.msra.mxu1 %v819_v21  ;;  %v825_v32 = vld [vmem:[#allocation7 + $0x20] sm:$0xff]   ;;  %v826_v34 = vld [vmem:[#allocation7 + $0x68] sm:$0xff]   ;;  %v799_v35 = vld [vmem:[#allocation5 + $0xb4] ss:$8 sps:$4 sm:$0xff]  }
  0x56   :  { %708 = vmatprep.subr.bf16.mxu1 %v820_v22  ;;  %v827_v36 = vld [vmem:[#allocation7 + $0x28] sm:$0xff]   ;;  %v801_v37 = vld [vmem:[#allocation5 + $0xb0] ss:$8 sps:$4 sm:$0xff]   ;;  %v805_v40 = vld [vmem:[#allocation5 + $0xd4] ss:$8 sps:$4 sm:$0xff]  }
  0x57   :  { %v802_v38 = vld [vmem:[#allocation5 + $0xc4] ss:$8 sps:$4 sm:$0xff]   ;;  %v804_v39 = vld [vmem:[#allocation5 + $0xc0] ss:$8 sps:$4 sm:$0xff]   ;;  %v807_v41 = vld [vmem:[#allocation5 + $0xd0] ss:$8 sps:$4 sm:$0xff]  }
  0x58   :  { %300 = vmatpush1.bf16.msra.mxu0 %v777_v7  ;;  %v808_v42 = vld [vmem:[#allocation5 + $0xe4] ss:$8 sps:$4 sm:$0xff]   ;;  %v810_v43 = vld [vmem:[#allocation5 + $0xe0] ss:$8 sps:$4 sm:$0xff]   ;;  %v811_v44 = vld [vmem:[#allocation5 + $0xf4] ss:$8 sps:$4 sm:$0xff]  }
  0x59   :  { %301 = vmatprep.subr.bf16.mxu0 %v778_v8  ;;  %709 = vmatpush3.bf16.msra.mxu1 %v821_v25  ;;  %v813_v45 = vld [vmem:[#allocation5 + $0xf0] ss:$8 sps:$4 sm:$0xff]   ;;  %v832_v4 = vld [vmem:[#allocation8] sm:$0xff]   ;;  %v833_v6 = vld [vmem:[#allocation8 + $0x8] sm:$0xff]  }
  0x5a   :  { %710 = vmatprep.subr.bf16.mxu1 %v822_v26  ;;  %v828_v47 = vld [vmem:[#allocation7 + $0x70] sm:$0xff]   ;;  %v830_v49 = vld [vmem:[#allocation7 + $0x78] sm:$0xff]  }
  0x5b   :  { %v829_v48 = vld [vmem:[#allocation7 + $0x30] sm:$0xff]   ;;  %v831_v50 = vld [vmem:[#allocation7 + $0x38] sm:$0xff]  }
  0x5c   :  { %302 = vmatpush1.bf16.msra.mxu0 %v780_v9  ;;  %v114_v55 = vld [vmem:[%s1086_s2] sm:$0x3]  ;;  %v834_v7 = vld [vmem:[#allocation8 + $0x10] sm:$0xff]   ;;  %v836_v9 = vld [vmem:[#allocation8 + $0x20] sm:$0xff]  }
  0x5d   :  { %303 = vmatprep.subr.bf16.mxu0 %v781_v10  ;;  %711 = vmatpush3.bf16.msra.mxu1 %v823_v29  ;;  %v119_v57 = vrot.slane %v114_v55, %v118_v54  ;;  %v123_v58 = vrot.slane %v114_v55, %v122_v56  ;;  %v835_v8 = vld [vmem:[#allocation8 + $0x18] sm:$0xff]   ;;  %v837_v10 = vld [vmem:[#allocation8 + $0x28] sm:$0xff]  }
  0x5e   :  { %712 = vmatprep.subr.bf16.mxu1 %v824_v30  ;;  %v678_v14 = vld [vmem:[%s1088_s4] ss:$0 sm:$0xff]  ;;  %s928_s4 = scalar_lea.vmem %s634_s8, 128 }
  0x5f   :  { %v695_v22 = vld [vmem:[%s1090_s6] ss:$0 sm:$0xff]  ;;  %p929_p4 = scmp.ne.s32.totalorder %s634_s8, %s928_s4  ;;  %p934_p6 = scmp.lt.s32.totalorder %s928_s4, %s928_s4 }
  0x60   :  { %304 = vmatpush1.bf16.msra.mxu0 %v783_v11  ;;  %v838_v11 = vld [vmem:[#allocation8 + $0x30] sm:$0xff]  }
  0x61   :  { %305 = vmatprep.subr.bf16.mxu0 %v784_v12  ;;  %713 = vmatpush3.bf16.msra.mxu1 %v825_v32  ;;  %v839_v12 = vld [vmem:[#allocation8 + $0x38] sm:$0xff]   ;;  %p935_p7 = por %p934_p6, %p933_p5 }
  0x62   :  { %714 = vmatprep.subr.bf16.mxu1 %v826_v34 }
  0x63   :  { %p936_p8 = pnand %p935_p7, %p929_p4 }
  0x64   :  { %306 = vmatpush1.bf16.msra.mxu0 %v786_v13 }
  0x65   :  { %307 = vmatprep.subr.bf16.mxu0 %v787_v15  ;;  %715 = vmatpush3.bf16.msra.mxu1 %v827_v36 }
  0x66   :  { %716 = vmatprep.subr.bf16.mxu1 %v828_v47 }
  0x68   :  { %308 = vmatpush1.bf16.msra.mxu0 %v789_v20 }
  0x69   :  { %309 = vmatprep.subr.bf16.mxu0 %v790_v23  ;;  %717 = vmatpush3.bf16.msra.mxu1 %v829_v48 }
  0x6a   :  { %718 = vmatprep.subr.bf16.mxu1 %v830_v49 }
  0x6c   :  { %310 = vmatpush1.bf16.msra.mxu0 %v792_v24 }
  0x6d   :  { %311 = vmatprep.subr.bf16.mxu0 %v793_v27  ;;  %719 = vmatpush3.bf16.msra.mxu1 %v831_v50 }
  0x6e   :  { %735 = vmatprep.subr.bf16.mxu1 %v966_v51 }
  0x70   :  { %312 = vmatpush1.bf16.msra.mxu0 %v795_v28 }
  0x71   :  { %313 = vmatprep.subr.bf16.mxu0 %v796_v31 }
  0x74   :  { %314 = vmatpush1.bf16.msra.mxu0 %v798_v33 }
  0x75   :  { %315 = vmatprep.subr.bf16.mxu0 %v799_v35 }
  0x78   :  { %316 = vmatpush1.bf16.msra.mxu0 %v801_v37 }
  0x79   :  { %317 = vmatprep.subr.bf16.mxu0 %v802_v38 }
  0x7c   :  { %318 = vmatpush1.bf16.msra.mxu0 %v804_v39 }
  0x7d   :  { %319 = vmatprep.subr.bf16.mxu0 %v805_v40 }
  0x80   :  { %320 = vmatpush1.bf16.msra.mxu0 %v807_v41 }
  0x81   :  { %321 = vmatprep.subr.bf16.mxu0 %v808_v42 }
  0x84   :  { %322 = vmatpush1.bf16.msra.mxu0 %v810_v43 }
  0x85   :  { %323 = vmatprep.subr.bf16.mxu0 %v811_v44 }
  0x88   :  { %324 = vmatpush1.bf16.msra.mxu0 %v813_v45 }
  0x8b   :  { %326 = vmatmul.mubr.bf16.vlgmr.msra.gmra.mrb[0].mxu0 %v644_v46 }
 0x15e   :  { %v327_v59 = vpop.f32.mrb[0].mxu0 }
 0x15f   :  { %v328_v60 = vadd.f32 %v327_v59, %v119_v57  ;;  %v329_v61 = vpop.f32.mrb[1].mxu0 }
 0x160   :  { %v330_v62 = vadd.f32 %v329_v61, %v123_v58  ;;  %v331_v63 = vpop.f32.mrb[2].mxu0 }
 0x161   :  { %v334_v0 = vmax.f32 %v328_v60, 0.0  ;;  %v332_v1 = vpop.f32.mrb[3].mxu0 }
 0x162   :  { %v335_v2 = vmax.f32 %v330_v62, 0.0 }
 0x163   :  { %v336_v5 = vpack.c.bf16 %v334_v0, %v334_v0 }
 0x164   :  { %v337_v3 = vpack.c.bf16 %v335_v2, %v335_v2 }
 0x166   :  { %505 = vmatprep.mubr.bf16.mxu1 %v337_v3 }
 0x167   :  { %506 = vmatmul.mubr.bf16.vlgmr.msra.gmra.mrb[0].mxu1 %v336_v5 }
 0x168   :  { %736 = vmatpush3.bf16.msra.mxu1 %v832_v4  ;;  %751 = vmatprep.mubr.msk.bf16.mxu1 %vm967_vm0, %v966_v51 }
 0x169   :  { %737 = vmatprep.subr.bf16.mxu1 %v966_v51 }
 0x16c   :  { %738 = vmatpush3.bf16.msra.mxu1 %v833_v6 }
 0x16d   :  { %739 = vmatprep.subr.bf16.mxu1 %v966_v51 }
 0x170   :  { %740 = vmatpush3.bf16.msra.mxu1 %v834_v7 }
 0x171   :  { %741 = vmatprep.subr.bf16.mxu1 %v966_v51 }
 0x174   :  { %742 = vmatpush3.bf16.msra.mxu1 %v835_v8 }
 0x175   :  { %743 = vmatprep.subr.bf16.mxu1 %v966_v51 }
 0x178   :  { %744 = vmatpush3.bf16.msra.mxu1 %v836_v9 }
 0x179   :  { %745 = vmatprep.subr.bf16.mxu1 %v966_v51 }
 0x17c   :  { %746 = vmatpush3.bf16.msra.mxu1 %v837_v10 }
 0x17d   :  { %747 = vmatprep.subr.bf16.mxu1 %v966_v51 }
 0x180   :  { %748 = vmatpush3.bf16.msra.mxu1 %v838_v11 }
 0x181   :  { %749 = vmatprep.subr.bf16.mxu1 %v966_v51 }
 0x184   :  { %750 = vmatpush3.bf16.msra.mxu1 %v839_v12 }
 0x23a   :  { %v720_v13 = vpop.f32.mrb[0].mxu1 }
 0x23b   :  { %v721_v15 = vpop.f32.mrb[1].mxu1 }
 0x23c   :  { %v722_v16 = vadd.f32 %v721_v15, %v720_v13  ;;  %v723_v17 = vpop.f32.mrb[2].mxu1 }
 0x23d   :  { %v724_v18 = vpop.f32.mrb[3].mxu1 }
 0x23e   :  { %v508_v19 = vadd.f32 %v722_v16, %v678_v14 }
 0x240   :  { %v513_v20 = vmax.f32 %v508_v19, 0.0 }
 0x242   :  { %v514_v21 = vpack.c.bf16 %v513_v20, %v513_v20 }
 0x244   :  { %752 = vmatmul.mubr.bf16.vlgmr.msra.gmra.mrb[4].mxu1 %v514_v21 }
 0x317   :  { %v620_v23 = vpop.f32.mrb[4].mxu1 }
 0x318   :  { %v621_v24 = vadd.f32 %v695_v22, %v620_v23  ;;  %v753_v25 = vpop.f32.mrb[5].mxu1 }
 0x319   :  { %v623_v26 = vpop.f32.mrb[6].mxu1 }
 0x31a   :  { %626 = vst [vmem:[#allocation10] sm:$0xff] %v621_v24  ;;  %v754_v27 = vpop.f32.mrb[7].mxu1 }
 0x31b   :  { %939 = shalt.err (!%p936_p8)
}
 0x31c   :  { %s940_s6 = scalar_lea.hbm %s1091_s7, 128 }
 0x31d   :  { %p941_p9 = scmp.ne.s32.totalorder %s1091_s7, %s940_s6  ;;  %p944_p10 = scmp.lt.u32.totalorder %s940_s6, %s1091_s7 }
 0x31f   :  { %p946_p11 = pnand %p944_p10, %p941_p9 }
 0x321   :  { %949 = shalt.err (!%p946_p11)
}
 0x322   :  { %636 = dma.vmem_to_hbm [thread:$0]  %s634_s8, 128, %s1091_s7, [#allocation4]  }
 0x323   :  { %956 = dma.done.wait [#allocation4], 128  }
 0x324   :  { %957 = vsyncadd [#allocation4], 4294967168 }
 0x325   :  { %640 = vsyncpa [#allocation3], 1 }
 0x326   :  { %641 = vsyncpa [#allocation6], 1 }
 0x327   :  { %642 = vsyncpa [#allocation9], 1 }
 0x328   :  { %643 = vsyncpa [#allocation4], 1 }

</bundles_post_ra>
